<compile_context>
chip_gen: v7x
topology: tpu7x:2x2x1
jax: 0.10.0
libtpu: 0.0.40
codegen_flags: <defaults>
</compile_context>

<pallas_src>
import functools
import math

import jax
import jax.numpy as jnp
from jax.experimental import pallas as pl
from jax.experimental.pallas import tpu as pltpu


def _mu_linear_kernel(x_ref, w_ref, b_ref, mu_ref):
    # mu = x @ W + b.  W is pre-transposed to (num_inputs, num_outputs) so the
    # RHS is already in the natural (K on sublanes, N on lanes) MXU layout.
    mu = jnp.dot(x_ref[...], w_ref[...], preferred_element_type=jnp.float32)
    mu_ref[...] = (mu + b_ref[...]).astype(mu_ref.dtype)


def _pick_batch_tile(batch: int, max_tile: int = 1024) -> int:
    """Full-extent block for small batches; otherwise a multiple-of-8 tile."""
    if batch <= max_tile:
        return batch          # block == full array dim is always legal
    return max_tile           # multiple of 8; ragged last tile is masked by Pallas


def gaussian_act_dist_forward(x, w, b, sigma_param, *,
                              min_sigma=1e-6, max_sigma=1.0, clip_sigma=True):
    """Pallas forward of GaussianActDist (sigma_as_params=True).

    x:           (batch, num_inputs)
    w:           (num_outputs, num_inputs)   -- torch.nn.Linear layout
    b:           (num_outputs,)
    sigma_param: (num_outputs,)

    Returns (mu, sigma, output_mu_sigma) with shapes
    (B, A), (B, A), (B, 2A), matching the PyTorch module.
    """
    batch, num_inputs = x.shape
    num_outputs = w.shape[0]

    # One-time wrapper-side layout change: (num_outputs, num_inputs) -> (K, N).
    w_t = jnp.asarray(w, jnp.float32).T
    b2 = jnp.asarray(b, jnp.float32).reshape(1, num_outputs)
    x32 = jnp.asarray(x, jnp.float32)

    tb = _pick_batch_tile(batch)
    grid = (pl.cdiv(batch, tb),)

    # VMEM budget: double-buffered x & mu tiles + resident W/b, 2x headroom.
    # (Explicit limit so big batch tiles still compile on v5e's 16 MiB scoped
    # default; capped at 64 MiB so the same number is valid on v7x.)
    tile_bytes = 4 * (2 * tb * num_inputs + 2 * tb * num_outputs
                      + num_inputs * num_outputs + num_outputs)
    vmem_limit = int(min(max(2 * tile_bytes, 16 * 1024 * 1024), 64 * 1024 * 1024))

    mu = pl.pallas_call(
        _mu_linear_kernel,
        out_shape=jax.ShapeDtypeStruct((batch, num_outputs), jnp.float32),
        grid_spec=pltpu.PrefetchScalarGridSpec(
            num_scalar_prefetch=0,
            grid=grid,
            in_specs=[
                pl.BlockSpec((tb, num_inputs), lambda i: (i, 0)),            # x tile
                pl.BlockSpec((num_inputs, num_outputs), lambda i: (0, 0)),   # resident W
                pl.BlockSpec((1, num_outputs), lambda i: (0, 0)),            # resident b
            ],
            out_specs=pl.BlockSpec((tb, num_outputs), lambda i: (i, 0)),     # mu tile
        ),
        compiler_params=pltpu.CompilerParams(
            dimension_semantics=("parallel",),       # batch tiles independent (v7x 2 TCs)
            vmem_limit_bytes=vmem_limit),
    )(x32, w_t, b2)

    # sigma epilogue: tiny (A,)-sized math -> plain JAX; XLA broadcasts / fuses
    # it into consumers instead of the kernel writing 3x redundant HBM traffic.
    sigma_row = jnp.exp(jnp.asarray(sigma_param, jnp.float32))
    if clip_sigma:
        sigma_row = jnp.clip(sigma_row, min_sigma, max_sigma)
    sigma = jnp.broadcast_to(sigma_row.reshape(1, num_outputs), (batch, num_outputs))
    output_mu_sigma = jnp.concatenate([mu, sigma], axis=1)
    return mu, sigma, output_mu_sigma


class CustomGaussianJax:
    """JAX-side equivalent of the torch CustomGaussian returned by forward()."""

    def __init__(self, mu, sigma):
        self.mu = mu
        self.sigma = sigma

    def deterministic_sample(self):
        return self.mu

    def log_probs(self, actions, sum_reduce=True):
        lp = (-(actions - self.mu) ** 2 / (2 * self.sigma ** 2)
              - math.log(math.sqrt(2 * math.pi)) - jnp.log(self.sigma))
        if sum_reduce:
            return lp.sum(axis=1, keepdims=True)
        return lp

    def entropy(self):
        return 0.5 + 0.5 * math.log(2 * math.pi) + jnp.log(self.sigma)


def _reference(x, w, b, sigma_param, min_sigma, max_sigma, clip_sigma):
    mu = x @ w.T + b
    sig = jnp.exp(sigma_param)
    if clip_sigma:
        sig = jnp.clip(sig, min_sigma, max_sigma)
    sig = jnp.broadcast_to(sig[None, :], mu.shape)
    return mu, sig, jnp.concatenate([mu, sig], axis=1)


if __name__ == "__main__":
    num_inputs = 32
    num_outputs = 8

    key = jax.random.PRNGKey(0)
    kw, kb, kx1, kx2 = jax.random.split(key, 4)

    # torch.nn.Linear default init: U(-1/sqrt(fan_in), 1/sqrt(fan_in))
    bound = 1.0 / math.sqrt(num_inputs)
    w = jax.random.uniform(kw, (num_outputs, num_inputs), jnp.float32, -bound, bound)
    b = jax.random.uniform(kb, (num_outputs,), jnp.float32, -bound, bound)
    sigma_param = jnp.zeros((num_outputs,), dtype=jnp.float32)  # nn.init.constant_(sigma, 0)

    # --- small shape (single full-extent block) ---
    batch = 4
    x = jax.random.normal(kx1, (batch, num_inputs), dtype=jnp.float32)
    mu, sigma, cat = gaussian_act_dist_forward(
        x, w, b, sigma_param, min_sigma=1e-6, max_sigma=1.0, clip_sigma=True)
    jax.block_until_ready((mu, sigma, cat))

    mu_r, sig_r, cat_r = _reference(x, w, b, sigma_param, 1e-6, 1.0, True)
    assert jnp.allclose(mu, mu_r, atol=1e-5, rtol=1e-5)
    assert jnp.allclose(sigma, sig_r, atol=1e-6)
    assert jnp.allclose(cat, cat_r, atol=1e-5, rtol=1e-5)

    # --- larger batch to exercise the tiled / multi-grid-step path ---
    batch2 = 2048
    x2 = jax.random.normal(kx2, (batch2, num_inputs), dtype=jnp.float32)
    mu2, sigma2, cat2 = gaussian_act_dist_forward(
        x2, w, b, sigma_param, min_sigma=1e-6, max_sigma=1.0, clip_sigma=True)
    jax.block_until_ready((mu2, sigma2, cat2))

    mu2_r, sig2_r, cat2_r = _reference(x2, w, b, sigma_param, 1e-6, 1.0, True)
    assert jnp.allclose(mu2, mu2_r, atol=1e-4, rtol=1e-5)
    assert jnp.allclose(sigma2, sig2_r, atol=1e-6)
    assert jnp.allclose(cat2, cat2_r, atol=1e-4, rtol=1e-5)

    # Distribution object mirrors CustomGaussian semantics.
    dist = CustomGaussianJax(mu, sigma)
    _ = jax.block_until_ready(dist.log_probs(dist.deterministic_sample()))
    _ = jax.block_until_ready(dist.entropy())

    print("KERNEL_OK")
</pallas_src>

<mosaic_0001>
module attributes {stable_mosaic.version = 11 : i64} {
  func.func @_mu_linear_kernel(%arg0: i32, %arg1: memref<4x32xf32, #tpu.memory_space<vmem>>, %arg2: memref<32x8xf32, #tpu.memory_space<vmem>>, %arg3: memref<1x8xf32, #tpu.memory_space<vmem>>, %arg4: memref<4x8xf32, #tpu.memory_space<vmem>>) attributes {dimension_semantics = [#tpu.dimension_semantics<parallel>], iteration_bounds = array<i64: 1>, scalar_prefetch = 0 : i64, scratch_operands = 0 : i64, tpu.core_type = #tpu.core_type<tc>, window_params = [{transform_indices = @transform_0, window_bounds = array<i64: 4, 32>}, {pipeline_mode = #tpu.pipeline_mode<synchronous>, transform_indices = @transform_1, window_bounds = array<i64: 32, 8>}, {pipeline_mode = #tpu.pipeline_mode<synchronous>, transform_indices = @transform_2, window_bounds = array<i64: 1, 8>}, {transform_indices = @transform_3, window_bounds = array<i64: 4, 8>}]} {
    %c0 = arith.constant 0 : index
    %c0_0 = arith.constant 0 : index
    %0 = vector.load %arg1[%c0, %c0_0] : memref<4x32xf32, #tpu.memory_space<vmem>>, vector<4x32xf32>
    %c0_1 = arith.constant 0 : index
    %c0_2 = arith.constant 0 : index
    %1 = vector.load %arg2[%c0_1, %c0_2] : memref<32x8xf32, #tpu.memory_space<vmem>>, vector<32x8xf32>
    %cst = arith.constant dense<0.000000e+00> : vector<4x8xf32>
    %2 = tpu.matmul %0, %1, %cst {dimension_numbers = #tpu.dot_dimension_numbers<[1], [0], [0], [1], [0, 0, 1, 1], [], []>} : vector<4x32xf32>, vector<32x8xf32>, vector<4x8xf32> -> vector<4x8xf32>
    %c0_3 = arith.constant 0 : index
    %c0_4 = arith.constant 0 : index
    %3 = vector.load %arg3[%c0_3, %c0_4] : memref<1x8xf32, #tpu.memory_space<vmem>>, vector<1x8xf32>
    %4 = vector.broadcast %3 : vector<1x8xf32> to vector<4x8xf32>
    %5 = arith.addf %2, %4 : vector<4x8xf32>
    %c0_5 = arith.constant 0 : index
    %c0_6 = arith.constant 0 : index
    %6 = vector.load %arg4[%c0_5, %c0_6] : memref<4x8xf32, #tpu.memory_space<vmem>>, vector<4x8xf32>
    tpu.vector_store %arg4[%c0_5, %c0_6], %5 {strides = array<i32>} : memref<4x8xf32, #tpu.memory_space<vmem>>, vector<4x8xf32>,
    return
  }
  func.func @transform_0(%arg0: i32) -> (i32, i32) {
    %c0_i32 = arith.constant 0 : i32
    %c0_i32_0 = arith.constant 0 : i32
    return %arg0, %c0_i32 : i32, i32
  }
  func.func @transform_1(%arg0: i32) -> (i32, i32) {
    %c0_i32 = arith.constant 0 : i32
    %c0_i32_0 = arith.constant 0 : i32
    %c0_i32_1 = arith.constant 0 : i32
    return %c0_i32, %c0_i32_0 : i32, i32
  }
  func.func @transform_2(%arg0: i32) -> (i32, i32) {
    %c0_i32 = arith.constant 0 : i32
    %c0_i32_0 = arith.constant 0 : i32
    %c0_i32_1 = arith.constant 0 : i32
    return %c0_i32, %c0_i32_0 : i32, i32
  }
  func.func @transform_3(%arg0: i32) -> (i32, i32) {
    %c0_i32 = arith.constant 0 : i32
    %c0_i32_0 = arith.constant 0 : i32
    return %arg0, %c0_i32 : i32, i32
  }
}

</mosaic_0001>

<bundles_post_ra>
// kernel: tpu_custom_call.1
= control target key start
LH: loop header
LB: loop body
LE: loop exit
PB: predicated region body
PF: predicated region fallthrough
CT: control target
= control target key end

     0   :  { %v169_v3 = vmov 0.0|0.0   ;;  %vm170_vm0 = vmmov 0   ;;  %v171_v6 = vmov 0.0   ;;  %s223_s0 = inlined_call_operand.vmem [shape: f32[4,32], index: 0, kind: input, shape index: {}]   ;;  %s224_s1 = inlined_call_operand.vmem [shape: f32[32,8], index: 1, kind: input, shape index: {}]   ;;  %s225_s2 = inlined_call_operand.vmem [shape: f32[1,8], index: 2, kind: input, shape index: {}]   ;;  %s226_s3 = inlined_call_operand.hbm [shape: f32[4,8], index: 3, kind: output, shape index: {}]  }
   0x1   :  { %v16_v0 = vld [vmem:[%s224_s1] sm:$0xff]  ;;  %v17_v1 = vld [vmem:[%s224_s1 + $0x8] sm:$0xff]  ;;  %v18_v2 = vld [vmem:[%s224_s1 + $0x10] sm:$0xff]  ;;  %135 = vmatprep.subr.bf16.mxu0 %v169_v3  ;;  %132 = vmatprep.mubr.msk.f32.mxu0 %vm170_vm0, %v171_v6 }
   0x2   :  { %v136_v4 = vpack.c.bf16 %v17_v1, %v16_v0  ;;  %v19_v5 = vld [vmem:[%s224_s1 + $0x18] sm:$0xff] }
   0x3   :  { %8 = vsyncpa [#allocation3], 0  ;;  %v139_v7 = vpack.c.bf16 %v19_v5, %v18_v2  ;;  %v15_v8 = vld [vmem:[%s223_s0] sm:$0xf]  ;;  %vm27_vm1 = vcmask 261120   ;;  %s172_s24 = smov [#allocation2]  }
   0x4   :  { %137 = vmatpush3.bf16.msra.mxu0 %v136_v4  ;;  %v117_v9 = vld [vmem:[%s225_s2] ss:$0 sm:$0xff]  ;;  %s109_s1 = sshll.u32 %s172_s24, 4  ;;  %vm101_vm2 = vcmask 60416   ;;  %s110_s1 = int_to_ptr.vmem [resolvable:$true] %s109_s1 }
   0x5   :  { %138 = vmatprep.subr.bf16.mxu0 %v169_v3  ;;  %s145_s25 = scalar_lea.vmem %s110_s1, 64  ;;  %p150_p1 = scmp.lt.s32.totalorder %s110_s1, %s110_s1 }
   0x6   :  { %p146_p0 = scmp.ne.s32.totalorder %s110_s1, %s145_s25  ;;  %p151_p2 = scmp.lt.s32.totalorder %s145_s25, %s145_s25 }
   0x8   :  { %140 = vmatpush3.bf16.msra.mxu0 %v139_v7  ;;  %p152_p3 = por %p151_p2, %p150_p1 }
   0xa   :  { %p153_p4 = pnand %p152_p3, %p146_p0 }
   0xb   :  { %133 = vmatmul.mubr.msk.f32.vlgmr.msra.gmra.mrb[0].mxu0 %vm27_vm1, %v15_v8 }
  0xde   :  { %v97_v10 = vpop.f32.mrb[0].mxu0 }
  0xdf   :  { %v98_v11 = vadd.f32 %v117_v9, %v97_v10  ;;  %v134_v12 = vpop.f32.mrb[1].mxu0 }
  0xe1   :  { %102 = vst.msk [vmem:[#allocation2] sm:$0xf] %vm101_vm2, %v98_v11 }
  0xe2   :  { %156 = shalt.err (!%p153_p4)
}
  0xe3   :  { %s157_s27 = scalar_lea.hbm %s226_s3, 64 }
  0xe4   :  { %p158_p5 = scmp.ne.s32.totalorder %s226_s3, %s157_s27  ;;  %p161_p6 = scmp.lt.u32.totalorder %s157_s27, %s226_s3 }
  0xe6   :  { %p163_p7 = pnand %p161_p6, %p158_p5 }
  0xe8   :  { %166 = shalt.err (!%p163_p7)
}
  0xe9   :  { %112 = dma.vmem_to_hbm [thread:$0]  %s110_s1, 64, %s226_s3, [#allocation3]  }
  0xea   :  { %167 = dma.done.wait [#allocation3], 64  }
  0xeb   :  { %168 = vsyncadd [#allocation3], 4294967232 }
  0xec   :  { %116 = vsyncpa [#allocation3], 1 }

</bundles_post_ra>
